<compile_context>
chip_gen: v5e
topology: v5e:2x2
jax: 0.10.0
libtpu: 0.0.40
codegen_flags: <defaults>
</compile_context>

<pallas_src>
import jax
import jax.numpy as jnp
import numpy as np
from jax.experimental import pallas as pl
from jax.experimental.pallas import tpu as pltpu


def gather_mean_kernel(idx_ref, emb_ref, mean_ref):
    """idx_ref: (B, C) int32 in SMEM; emb_ref: (V, D) f32 in VMEM; mean_ref: (B, D) bf16."""
    B, C = idx_ref.shape
    rows = []
    for b in range(B):
        acc = emb_ref[pl.ds(idx_ref[b, 0], 1), :]          # (1, D) f32
        for c in range(1, C):
            acc = acc + emb_ref[pl.ds(idx_ref[b, c], 1), :]
        rows.append(acc)
    mean = jnp.concatenate(rows, axis=0) * (1.0 / C)        # (B, D) f32 accumulate
    mean_ref[...] = mean.astype(mean_ref.dtype)             # single lane-dense bf16 store


def linear_kernel(mean_ref, w_ref, b_ref, out_ref):
    """(B, D) bf16 @ (D, TN) bf16 on the MXU, f32 accumulate, bias folded into the store."""
    out_ref[...] = (
        jnp.dot(mean_ref[...], w_ref[...], preferred_element_type=jnp.float32)
        + b_ref[...]
    )


def prepare_params(emb_table, lin_w, lin_b):
    """One-time param prep: keep W pre-transposed bf16 (D, V) and bias as (1, V)."""
    # TODO(synk): on v7x, optionally store w_t in fp8 (f32 accumulate) to halve the
    # dominant W^T HBM stream again; fp8 is not a drop-in on v5e/v6e.
    emb = jnp.asarray(emb_table, jnp.float32)                       # (V, D)
    w_t = jnp.asarray(lin_w, jnp.float32).T.astype(jnp.bfloat16)    # (D, V)
    bias = jnp.asarray(lin_b, jnp.float32).reshape(1, -1)           # (1, V)
    return emb, w_t, bias


def _context_mean(x_idx, emb_table):
    B, C = x_idx.shape
    V, D = emb_table.shape
    # Whole (V, D) table goes to VMEM in one bandwidth-efficient DMA; good for
    # tables up to a few MiB (the demo table is 128 KiB).
    # TODO(synk): for vocabularies whose table does not fit VMEM, switch to an
    # HBM-resident table (pl.ANY) with all B*C row DMAs issued before any wait.
    vmem_bytes = 2 * V * D * 4 + 2 * B * D * 2 + (1 << 20)
    return pl.pallas_call(
        gather_mean_kernel,
        out_shape=jax.ShapeDtypeStruct((B, D), jnp.bfloat16),
        grid_spec=pltpu.PrefetchScalarGridSpec(
            num_scalar_prefetch=1,                                  # x_idx -> SMEM
            grid=(1,),
            in_specs=[pl.BlockSpec((V, D), lambda j, idx: (0, 0))],  # whole table
            out_specs=pl.BlockSpec((B, D), lambda j, idx: (0, 0)),
        ),
        compiler_params=pltpu.CompilerParams(
            dimension_semantics=("arbitrary",),
            vmem_limit_bytes=min(vmem_bytes, 100 * 1024 * 1024),
        ),
    )(x_idx.astype(jnp.int32), emb_table)


def _linear(mean_bf16, w_t, bias, *, block_v):
    B, D = mean_bf16.shape
    _, V = w_t.shape
    TN = V if V <= block_v else block_v          # small V: no tiling, grid=(1,)
    assert TN == V or TN % 128 == 0, "vocab tile must be 128-aligned when tiling"
    grid = (pl.cdiv(V, TN),)

    cost = pl.CostEstimate(
        flops=2 * B * D * V,
        transcendentals=0,
        bytes_accessed=D * V * 2 + B * D * 2 + B * V * 4 + V * 4,
    )
    # Double-buffered W^T / bias / out tiles + the resident bf16 mean, plus headroom.
    vmem_bytes = 2 * (D * TN * 2 + B * TN * 4 + TN * 4) + 2 * B * D * 2 + (1 << 20)

    return pl.pallas_call(
        linear_kernel,
        out_shape=jax.ShapeDtypeStruct((B, V), jnp.float32),
        grid_spec=pltpu.PrefetchScalarGridSpec(
            num_scalar_prefetch=0,
            grid=grid,
            in_specs=[
                pl.BlockSpec((B, D), lambda j: (0, 0)),    # context mean (bf16)
                pl.BlockSpec((D, TN), lambda j: (0, j)),   # W^T column tile (bf16)
                pl.BlockSpec((1, TN), lambda j: (0, j)),   # bias tile (lane-dense)
            ],
            out_specs=pl.BlockSpec((B, TN), lambda j: (0, j)),
        ),
        compiler_params=pltpu.CompilerParams(
            dimension_semantics=("parallel",),             # v7x: both TCs stream W^T
            vmem_limit_bytes=min(vmem_bytes, 100 * 1024 * 1024),
        ),
        cost_estimate=cost,
    )(mean_bf16, w_t, bias)


def cbow_forward(x_idx, emb_table, w_t, bias, *, block_v=1024):
    mean = _context_mean(x_idx, emb_table)       # (B, D) bf16, tiny separate kernel
    return _linear(mean, w_t, bias, block_v=block_v)


def reference_forward(x_idx, emb_table, lin_w, lin_b):
    out = emb_table[x_idx]            # (B, C, D)
    out = out.mean(axis=1)            # (B, D)
    return out @ lin_w.T + lin_b      # (B, V)


if __name__ == "__main__":
    vocab_size = 256
    embedding_dim = 128
    batch = 8
    context = 8
    padding_idx = 1                   # nn.Embedding(vocab_size, embedding_dim, 1)

    key = jax.random.PRNGKey(0)
    k_emb, k_w, k_b, k_x = jax.random.split(key, 4)

    # nn.Embedding default init: N(0, 1); padding_idx row zeroed.
    emb_table = jax.random.normal(k_emb, (vocab_size, embedding_dim), jnp.float32)
    emb_table = emb_table.at[padding_idx].set(0.0)

    # nn.Linear default init: U(-1/sqrt(fan_in), 1/sqrt(fan_in)).
    bound = 1.0 / np.sqrt(embedding_dim)
    lin_w = jax.random.uniform(k_w, (vocab_size, embedding_dim), jnp.float32,
                               -bound, bound)
    lin_b = jax.random.uniform(k_b, (vocab_size,), jnp.float32, -bound, bound)

    x_idx = jax.random.randint(k_x, (batch, context), 0, vocab_size, jnp.int32)

    # One-time param prep (transpose + bf16 cast hoisted off the per-call path).
    emb, w_t, bias = prepare_params(emb_table, lin_w, lin_b)

    fwd = jax.jit(cbow_forward)
    out = jax.block_until_ready(fwd(x_idx, emb, w_t, bias))

    ref = reference_forward(x_idx, emb_table, lin_w, lin_b)
    # bf16 mean + bf16 W (f32 accumulation) -> relaxed tolerance vs pure-f32 reference.
    np.testing.assert_allclose(np.asarray(out), np.asarray(ref), rtol=1e-2, atol=1e-2)
    print("KERNEL_OK")
</pallas_src>

<mosaic_0001>
module attributes {stable_mosaic.version = 11 : i64} {
  func.func @linear_kernel(%arg0: i32, %arg1: memref<8x128xbf16, #tpu.memory_space<vmem>>, %arg2: memref<128x256xbf16, #tpu.memory_space<vmem>>, %arg3: memref<1x256xf32, #tpu.memory_space<vmem>>, %arg4: memref<8x256xf32, #tpu.memory_space<vmem>>) attributes {dimension_semantics = [#tpu.dimension_semantics<parallel>], iteration_bounds = array<i64: 1>, scalar_prefetch = 0 : i64, scratch_operands = 0 : i64, tpu.core_type = #tpu.core_type<tc>, window_params = [{pipeline_mode = #tpu.pipeline_mode<synchronous>, transform_indices = @transform_0, window_bounds = array<i64: 8, 128>}, {transform_indices = @transform_1, window_bounds = array<i64: 128, 256>}, {transform_indices = @transform_2, window_bounds = array<i64: 1, 256>}, {transform_indices = @transform_3, window_bounds = array<i64: 8, 256>}]} {
    %c0 = arith.constant 0 : index
    %c0_0 = arith.constant 0 : index
    %0 = vector.load %arg1[%c0, %c0_0] : memref<8x128xbf16, #tpu.memory_space<vmem>>, vector<8x128xbf16>
    %c0_1 = arith.constant 0 : index
    %c0_2 = arith.constant 0 : index
    %1 = vector.load %arg2[%c0_1, %c0_2] : memref<128x256xbf16, #tpu.memory_space<vmem>>, vector<128x256xbf16>
    %cst = arith.constant dense<0.000000e+00> : vector<8x256xf32>
    %2 = tpu.matmul %0, %1, %cst {dimension_numbers = #tpu.dot_dimension_numbers<[1], [0], [0], [1], [0, 0, 1, 1], [], []>} : vector<8x128xbf16>, vector<128x256xbf16>, vector<8x256xf32> -> vector<8x256xf32>
    %c0_3 = arith.constant 0 : index
    %c0_4 = arith.constant 0 : index
    %3 = vector.load %arg3[%c0_3, %c0_4] : memref<1x256xf32, #tpu.memory_space<vmem>>, vector<1x256xf32>
    %4 = vector.broadcast %3 : vector<1x256xf32> to vector<8x256xf32>
    %5 = arith.addf %2, %4 : vector<8x256xf32>
    %c0_5 = arith.constant 0 : index
    %c0_6 = arith.constant 0 : index
    %6 = vector.load %arg4[%c0_5, %c0_6] : memref<8x256xf32, #tpu.memory_space<vmem>>, vector<8x256xf32>
    tpu.vector_store %arg4[%c0_5, %c0_6], %5 {strides = array<i32>} : memref<8x256xf32, #tpu.memory_space<vmem>>, vector<8x256xf32>,
    return
  }
  func.func @transform_0(%arg0: i32) -> (i32, i32) {
    %c0_i32 = arith.constant 0 : i32
    %c0_i32_0 = arith.constant 0 : i32
    %c0_i32_1 = arith.constant 0 : i32
    return %c0_i32, %c0_i32_0 : i32, i32
  }
  func.func @transform_1(%arg0: i32) -> (i32, i32) {
    %c0_i32 = arith.constant 0 : i32
    %c0_i32_0 = arith.constant 0 : i32
    return %c0_i32, %arg0 : i32, i32
  }
  func.func @transform_2(%arg0: i32) -> (i32, i32) {
    %c0_i32 = arith.constant 0 : i32
    %c0_i32_0 = arith.constant 0 : i32
    return %c0_i32, %arg0 : i32, i32
  }
  func.func @transform_3(%arg0: i32) -> (i32, i32) {
    %c0_i32 = arith.constant 0 : i32
    %c0_i32_0 = arith.constant 0 : i32
    return %c0_i32, %arg0 : i32, i32
  }
}

module attributes {stable_mosaic.version = 11 : i64} {
  func.func @gather_mean_kernel(%arg0: i32, %arg1: memref<8x8xi32, #tpu.memory_space<smem>>, %arg2: memref<256x128xf32, #tpu.memory_space<vmem>>, %arg3: memref<8x128xbf16, #tpu.memory_space<vmem>>) attributes {dimension_semantics = [#tpu.dimension_semantics<arbitrary>], iteration_bounds = array<i64: 1>, scalar_prefetch = 1 : i64, scratch_operands = 0 : i64, tpu.core_type = #tpu.core_type<tc>, window_params = [{pipeline_mode = #tpu.pipeline_mode<synchronous>, transform_indices = @transform_0, window_bounds = array<i64: 256, 128>}, {pipeline_mode = #tpu.pipeline_mode<synchronous>, transform_indices = @transform_1, window_bounds = array<i64: 8, 128>}]} {
    %c0 = arith.constant 0 : index
    %c0_0 = arith.constant 0 : index
    %0 = memref.load %arg1[%c0, %c0_0] : memref<8x8xi32, #tpu.memory_space<smem>>
    %1 = arith.index_cast %0 : i32 to index
    %c0_1 = arith.constant 0 : index
    %2 = vector.load %arg2[%1, %c0_1] : memref<256x128xf32, #tpu.memory_space<vmem>>, vector<1x128xf32>
    %c0_2 = arith.constant 0 : index
    %c1 = arith.constant 1 : index
    %3 = memref.load %arg1[%c0_2, %c1] : memref<8x8xi32, #tpu.memory_space<smem>>
    %4 = arith.index_cast %3 : i32 to index
    %c0_3 = arith.constant 0 : index
    %5 = vector.load %arg2[%4, %c0_3] : memref<256x128xf32, #tpu.memory_space<vmem>>, vector<1x128xf32>
    %6 = arith.addf %2, %5 : vector<1x128xf32>
    %c0_4 = arith.constant 0 : index
    %c2 = arith.constant 2 : index
    %7 = memref.load %arg1[%c0_4, %c2] : memref<8x8xi32, #tpu.memory_space<smem>>
    %8 = arith.index_cast %7 : i32 to index
    %c0_5 = arith.constant 0 : index
    %9 = vector.load %arg2[%8, %c0_5] : memref<256x128xf32, #tpu.memory_space<vmem>>, vector<1x128xf32>
    %10 = arith.addf %6, %9 : vector<1x128xf32>
    %c0_6 = arith.constant 0 : index
    %c3 = arith.constant 3 : index
    %11 = memref.load %arg1[%c0_6, %c3] : memref<8x8xi32, #tpu.memory_space<smem>>
    %12 = arith.index_cast %11 : i32 to index
    %c0_7 = arith.constant 0 : index
    %13 = vector.load %arg2[%12, %c0_7] : memref<256x128xf32, #tpu.memory_space<vmem>>, vector<1x128xf32>
    %14 = arith.addf %10, %13 : vector<1x128xf32>
    %c0_8 = arith.constant 0 : index
    %c4 = arith.constant 4 : index
    %15 = memref.load %arg1[%c0_8, %c4] : memref<8x8xi32, #tpu.memory_space<smem>>
    %16 = arith.index_cast %15 : i32 to index
    %c0_9 = arith.constant 0 : index
    %17 = vector.load %arg2[%16, %c0_9] : memref<256x128xf32, #tpu.memory_space<vmem>>, vector<1x128xf32>
    %18 = arith.addf %14, %17 : vector<1x128xf32>
    %c0_10 = arith.constant 0 : index
    %c5 = arith.constant 5 : index
    %19 = memref.load %arg1[%c0_10, %c5] : memref<8x8xi32, #tpu.memory_space<smem>>
    %20 = arith.index_cast %19 : i32 to index
    %c0_11 = arith.constant 0 : index
    %21 = vector.load %arg2[%20, %c0_11] : memref<256x128xf32, #tpu.memory_space<vmem>>, vector<1x128xf32>
    %22 = arith.addf %18, %21 : vector<1x128xf32>
    %c0_12 = arith.constant 0 : index
    %c6 = arith.constant 6 : index
    %23 = memref.load %arg1[%c0_12, %c6] : memref<8x8xi32, #tpu.memory_space<smem>>
    %24 = arith.index_cast %23 : i32 to index
    %c0_13 = arith.constant 0 : index
    %25 = vector.load %arg2[%24, %c0_13] : memref<256x128xf32, #tpu.memory_space<vmem>>, vector<1x128xf32>
    %26 = arith.addf %22, %25 : vector<1x128xf32>
    %c0_14 = arith.constant 0 : index
    %c7 = arith.constant 7 : index
    %27 = memref.load %arg1[%c0_14, %c7] : memref<8x8xi32, #tpu.memory_space<smem>>
    %28 = arith.index_cast %27 : i32 to index
    %c0_15 = arith.constant 0 : index
    %29 = vector.load %arg2[%28, %c0_15] : memref<256x128xf32, #tpu.memory_space<vmem>>, vector<1x128xf32>
    %30 = arith.addf %26, %29 : vector<1x128xf32>
    %c1_16 = arith.constant 1 : index
    %c0_17 = arith.constant 0 : index
    %31 = memref.load %arg1[%c1_16, %c0_17] : memref<8x8xi32, #tpu.memory_space<smem>>
    %32 = arith.index_cast %31 : i32 to index
    %c0_18 = arith.constant 0 : index
    %33 = vector.load %arg2[%32, %c0_18] : memref<256x128xf32, #tpu.memory_space<vmem>>, vector<1x128xf32>
    %c1_19 = arith.constant 1 : index
    %c1_20 = arith.constant 1 : index
    %34 = memref.load %arg1[%c1_19, %c1_20] : memref<8x8xi32, #tpu.memory_space<smem>>
    %35 = arith.index_cast %34 : i32 to index
    %c0_21 = arith.constant 0 : index
    %36 = vector.load %arg2[%35, %c0_21] : memref<256x128xf32, #tpu.memory_space<vmem>>, vector<1x128xf32>
    %37 = arith.addf %33, %36 : vector<1x128xf32>
    %c1_22 = arith.constant 1 : index
    %c2_23 = arith.constant 2 : index
    %38 = memref.load %arg1[%c1_22, %c2_23] : memref<8x8xi32, #tpu.memory_space<smem>>
    %39 = arith.index_cast %38 : i32 to index
    %c0_24 = arith.constant 0 : index
    %40 = vector.load %arg2[%39, %c0_24] : memref<256x128xf32, #tpu.memory_space<vmem>>, vector<1x128xf32>
    %41 = arith.addf %37, %40 : vector<1x128xf32>
    %c1_25 = arith.constant 1 : index
    %c3_26 = arith.constant 3 : index
    %42 = memref.load %arg1[%c1_25, %c3_26] : memref<8x8xi32, #tpu.memory_space<smem>>
    %43 = arith.index_cast %42 : i32 to index
    %c0_27 = arith.constant 0 : index
    %44 = vector.load %arg2[%43, %c0_27] : memref<256x128xf32, #tpu.memory_space<vmem>>, vector<1x128xf32>
    %45 = arith.addf %41, %44 : vector<1x128xf32>
    %c1_28 = arith.constant 1 : index
    %c4_29 = arith.constant 4 : index
    %46 = memref.load %arg1[%c1_28, %c4_29] : memref<8x8xi32, #tpu.memory_space<smem>>
    %47 = arith.index_cast %46 : i32 to index
    %c0_30 = arith.constant 0 : index
    %48 = vector.load %arg2[%47, %c0_30] : memref<256x128xf32, #tpu.memory_space<vmem>>, vector<1x128xf32>
    %49 = arith.addf %45, %48 : vector<1x128xf32>
    %c1_31 = arith.constant 1 : index
    %c5_32 = arith.constant 5 : index
    %50 = memref.load %arg1[%c1_31, %c5_32] : memref<8x8xi32, #tpu.memory_space<smem>>
    %51 = arith.index_cast %50 : i32 to index
    %c0_33 = arith.constant 0 : index
    %52 = vector.load %arg2[%51, %c0_33] : memref<256x128xf32, #tpu.memory_space<vmem>>, vector<1x128xf32>
    %53 = arith.addf %49, %52 : vector<1x128xf32>
    %c1_34 = arith.constant 1 : index
    %c6_35 = arith.constant 6 : index
    %54 = memref.load %arg1[%c1_34, %c6_35] : memref<8x8xi32, #tpu.memory_space<smem>>
    %55 = arith.index_cast %54 : i32 to index
    %c0_36 = arith.constant 0 : index
    %56 = vector.load %arg2[%55, %c0_36] : memref<256x128xf32, #tpu.memory_space<vmem>>, vector<1x128xf32>
    %57 = arith.addf %53, %56 : vector<1x128xf32>
    %c1_37 = arith.constant 1 : index
    %c7_38 = arith.constant 7 : index
    %58 = memref.load %arg1[%c1_37, %c7_38] : memref<8x8xi32, #tpu.memory_space<smem>>
    %59 = arith.index_cast %58 : i32 to index
    %c0_39 = arith.constant 0 : index
    %60 = vector.load %arg2[%59, %c0_39] : memref<256x128xf32, #tpu.memory_space<vmem>>, vector<1x128xf32>
    %61 = arith.addf %57, %60 : vector<1x128xf32>
    %c2_40 = arith.constant 2 : index
    %c0_41 = arith.constant 0 : index
    %62 = memref.load %arg1[%c2_40, %c0_41] : memref<8x8xi32, #tpu.memory_space<smem>>
    %63 = arith.index_cast %62 : i32 to index
    %c0_42 = arith.constant 0 : index
    %64 = vector.load %arg2[%63, %c0_42] : memref<256x128xf32, #tpu.memory_space<vmem>>, vector<1x128xf32>
    %c2_43 = arith.constant 2 : index
    %c1_44 = arith.constant 1 : index
    %65 = memref.load %arg1[%c2_43, %c1_44] : memref<8x8xi32, #tpu.memory_space<smem>>
    %66 = arith.index_cast %65 : i32 to index
    %c0_45 = arith.constant 0 : index
    %67 = vector.load %arg2[%66, %c0_45] : memref<256x128xf32, #tpu.memory_space<vmem>>, vector<1x128xf32>
    %68 = arith.addf %64, %67 : vector<1x128xf32>
    %c2_46 = arith.constant 2 : index
    %c2_47 = arith.constant 2 : index
    %69 = memref.load %arg1[%c2_46, %c2_47] : memref<8x8xi32, #tpu.memory_space<smem>>
    %70 = arith.index_cast %69 : i32 to index
    %c0_48 = arith.constant 0 : index
    %71 = vector.load %arg2[%70, %c0_48] : memref<256x128xf32, #tpu.memory_space<vmem>>, vector<1x128xf32>
    %72 = arith.addf %68, %71 : vector<1x128xf32>
    %c2_49 = arith.constant 2 : index
    %c3_50 = arith.constant 3 : index
    %73 = memref.load %arg1[%c2_49, %c3_50] : memref<8x8xi32, #tpu.memory_space<smem>>
    %74 = arith.index_cast %73 : i32 to index
    %c0_51 = arith.constant 0 : index
    %75 = vector.load %arg2[%74, %c0_51] : memref<256x128xf32, #tpu.memory_space<vmem>>, vector<1x128xf32>
    %76 = arith.addf %72, %75 : vector<1x128xf32>
    %c2_52 = arith.constant 2 : index
    %c4_53 = arith.constant 4 : index
    %77 = memref.load %arg1[%c2_52, %c4_53] : memref<8x8xi32, #tpu.memory_space<smem>>
    %78 = arith.index_cast %77 : i32 to index
    %c0_54 = arith.constant 0 : index
    %79 = vector.load %arg2[%78, %c0_54] : memref<256x128xf32, #tpu.memory_space<vmem>>, vector<1x128xf32>
    %80 = arith.addf %76, %79 : vector<1x128xf32>
    %c2_55 = arith.constant 2 : index
    %c5_56 = arith.constant 5 : index
    %81 = memref.load %arg1[%c2_55, %c5_56] : memref<8x8xi32, #tpu.memory_space<smem>>
    %82 = arith.index_cast %81 : i32 to index
    %c0_57 = arith.constant 0 : index
    %83 = vector.load %arg2[%82, %c0_57] : memref<256x128xf32, #tpu.memory_space<vmem>>, vector<1x128xf32>
    %84 = arith.addf %80, %83 : vector<1x128xf32>
    %c2_58 = arith.constant 2 : index
    %c6_59 = arith.constant 6 : index
    %85 = memref.load %arg1[%c2_58, %c6_59] : memref<8x8xi32, #tpu.memory_space<smem>>
    %86 = arith.index_cast %85 : i32 to index
    %c0_60 = arith.constant 0 : index
    %87 = vector.load %arg2[%86, %c0_60] : memref<256x128xf32, #tpu.memory_space<vmem>>, vector<1x128xf32>
    %88 = arith.addf %84, %87 : vector<1x128xf32>
    %c2_61 = arith.constant 2 : index
    %c7_62 = arith.constant 7 : index
    %89 = memref.load %arg1[%c2_61, %c7_62] : memref<8x8xi32, #tpu.memory_space<smem>>
    %90 = arith.index_cast %89 : i32 to index
    %c0_63 = arith.constant 0 : index
    %91 = vector.load %arg2[%90, %c0_63] : memref<256x128xf32, #tpu.memory_space<vmem>>, vector<1x128xf32>
    %92 = arith.addf %88, %91 : vector<1x128xf32>
    %c3_64 = arith.constant 3 : index
    %c0_65 = arith.constant 0 : index
    %93 = memref.load %arg1[%c3_64, %c0_65] : memref<8x8xi32, #tpu.memory_space<smem>>
    %94 = arith.index_cast %93 : i32 to index
    %c0_66 = arith.constant 0 : index
    %95 = vector.load %arg2[%94, %c0_66] : memref<256x128xf32, #tpu.memory_space<vmem>>, vector<1x128xf32>
    %c3_67 = arith.constant 3 : index
    %c1_68 = arith.constant 1 : index
    %96 = memref.load %arg1[%c3_67, %c1_68] : memref<8x8xi32, #tpu.memory_space<smem>>
    %97 = arith.index_cast %96 : i32 to index
    %c0_69 = arith.constant 0 : index
    %98 = vector.load %arg2[%97, %c0_69] : memref<256x128xf32, #tpu.memory_space<vmem>>, vector<1x128xf32>
    %99 = arith.addf %95, %98 : vector<1x128xf32>
    %c3_70 = arith.constant 3 : index
    %c2_71 = arith.constant 2 : index
    %100 = memref.load %arg1[%c3_70, %c2_71] : memref<8x8xi32, #tpu.memory_space<smem>>
    %101 = arith.index_cast %100 : i32 to index
    %c0_72 = arith.constant 0 : index
    %102 = vector.load %arg2[%101, %c0_72] : memref<256x128xf32, #tpu.memory_space<vmem>>, vector<1x128xf32>
    %103 = arith.addf %99, %102 : vector<1x128xf32>
    %c3_73 = arith.constant 3 : index
    %c3_74 = arith.constant 3 : index
    %104 = memref.load %arg1[%c3_73, %c3_74] : memref<8x8xi32, #tpu.memory_space<smem>>
    %105 = arith.index_cast %104 : i32 to index
    %c0_75 = arith.constant 0 : index
    %106 = vector.load %arg2[%105, %c0_75] : memref<256x128xf32, #tpu.memory_space<vmem>>, vector<1x128xf32>
    %107 = arith.addf %103, %106 : vector<1x128xf32>
    %c3_76 = arith.constant 3 : index
    %c4_77 = arith.constant 4 : index
    %108 = memref.load %arg1[%c3_76, %c4_77] : memref<8x8xi32, #tpu.memory_space<smem>>
    %109 = arith.index_cast %108 : i32 to index
    %c0_78 = arith.constant 0 : index
    %110 = vector.load %arg2[%109, %c0_78] : memref<256x128xf32, #tpu.memory_space<vmem>>, vector<1x128xf32>
    %111 = arith.addf %107, %110 : vector<1x128xf32>
    %c3_79 = arith.constant 3 : index
    %c5_80 = arith.constant 5 : index
    %112 = memref.load %arg1[%c3_79, %c5_80] : memref<8x8xi32, #tpu.memory_space<smem>>
    %113 = arith.index_cast %112 : i32 to index
    %c0_81 = arith.constant 0 : index
    %114 = vector.load %arg2[%113, %c0_81] : memref<256x128xf32, #tpu.memory_space<vmem>>, vector<1x128xf32>
    %115 = arith.addf %111, %114 : vector<1x128xf32>
    %c3_82 = arith.constant 3 : index
    %c6_83 = arith.constant 6 : index
    %116 = memref.load %arg1[%c3_82, %c6_83] : memref<8x8xi32, #tpu.memory_space<smem>>
    %117 = arith.index_cast %116 : i32 to index
    %c0_84 = arith.constant 0 : index
    %118 = vector.load %arg2[%117, %c0_84] : memref<256x128xf32, #tpu.memory_space<vmem>>, vector<1x128xf32>
    %119 = arith.addf %115, %118 : vector<1x128xf32>
    %c3_85 = arith.constant 3 : index
    %c7_86 = arith.constant 7 : index
    %120 = memref.load %arg1[%c3_85, %c7_86] : memref<8x8xi32, #tpu.memory_space<smem>>
    %121 = arith.index_cast %120 : i32 to index
    %c0_87 = arith.constant 0 : index
    %122 = vector.load %arg2[%121, %c0_87] : memref<256x128xf32, #tpu.memory_space<vmem>>, vector<1x128xf32>
    %123 = arith.addf %119, %122 : vector<1x128xf32>
    %c4_88 = arith.constant 4 : index
    %c0_89 = arith.constant 0 : index
    %124 = memref.load %arg1[%c4_88, %c0_89] : memref<8x8xi32, #tpu.memory_space<smem>>
    %125 = arith.index_cast %124 : i32 to index
    %c0_90 = arith.constant 0 : index
    %126 = vector.load %arg2[%125, %c0_90] : memref<256x128xf32, #tpu.memory_space<vmem>>, vector<1x128xf32>
    %c4_91 = arith.constant 4 : index
    %c1_92 = arith.constant 1 : index
    %127 = memref.load %arg1[%c4_91, %c1_92] : memref<8x8xi32, #tpu.memory_space<smem>>
    %128 = arith.index_cast %127 : i32 to index
    %c0_93 = arith.constant 0 : index
    %129 = vector.load %arg2[%128, %c0_93] : memref<256x128xf32, #tpu.memory_space<vmem>>, vector<1x128xf32>
    %130 = arith.addf %126, %129 : vector<1x128xf32>
    %c4_94 = arith.constant 4 : index
    %c2_95 = arith.constant 2 : index
    %131 = memref.load %arg1[%c4_94, %c2_95] : memref<8x8xi32, #tpu.memory_space<smem>>
    %132 = arith.index_cast %131 : i32 to index
    %c0_96 = arith.constant 0 : index
    %133 = vector.load %arg2[%132, %c0_96] : memref<256x128xf32, #tpu.memory_space<vmem>>, vector<1x128xf32>
    %134 = arith.addf %130, %133 : vector<1x128xf32>
    %c4_97 = arith.constant 4 : index
    %c3_98 = arith.constant 3 : index
    %135 = memref.load %arg1[%c4_97, %c3_98] : memref<8x8xi32, #tpu.memory_space<smem>>
    %136 = arith.index_cast %135 : i32 to index
    %c0_99 = arith.constant 0 : index
    %137 = vector.load %arg2[%136, %c0_99] : memref<256x128xf32, #tpu.memory_space<vmem>>, vector<1x128xf32>
    %138 = arith.addf %134, %137 : vector<1x128xf32>
    %c4_100 = arith.constant 4 : index
    %c4_101 = arith.constant 4 : index
    %139 = memref.load %arg1[%c4_100, %c4_101] : memref<8x8xi32, #tpu.memory_space<smem>>
    %140 = arith.index_cast %139 : i32 to index
    %c0_102 = arith.constant 0 : index
    %141 = vector.load %arg2[%140, %c0_102] : memref<256x128xf32, #tpu.memory_space<vmem>>, vector<1x128xf32>
    %142 = arith.addf %138, %141 : vector<1x128xf32>
    %c4_103 = arith.constant 4 : index
    %c5_104 = arith.constant 5 : index
    %143 = memref.load %arg1[%c4_103, %c5_104] : memref<8x8xi32, #tpu.memory_space<smem>>
    %144 = arith.index_cast %143 : i32 to index
    %c0_105 = arith.constant 0 : index
    %145 = vector.load %arg2[%144, %c0_105] : memref<256x128xf32, #tpu.memory_space<vmem>>, vector<1x128xf32>
    %146 = arith.addf %142, %145 : vector<1x128xf32>
    %c4_106 = arith.constant 4 : index
    %c6_107 = arith.constant 6 : index
    %147 = memref.load %arg1[%c4_106, %c6_107] : memref<8x8xi32, #tpu.memory_space<smem>>
    %148 = arith.index_cast %147 : i32 to index
    %c0_108 = arith.constant 0 : index
    %149 = vector.load %arg2[%148, %c0_108] : memref<256x128xf32, #tpu.memory_space<vmem>>, vector<1x128xf32>
    %150 = arith.addf %146, %149 : vector<1x128xf32>
    %c4_109 = arith.constant 4 : index
    %c7_110 = arith.constant 7 : index
    %151 = memref.load %arg1[%c4_109, %c7_110] : memref<8x8xi32, #tpu.memory_space<smem>>
    %152 = arith.index_cast %151 : i32 to index
    %c0_111 = arith.constant 0 : index
    %153 = vector.load %arg2[%152, %c0_111] : memref<256x128xf32, #tpu.memory_space<vmem>>, vector<1x128xf32>
    %154 = arith.addf %150, %153 : vector<1x128xf32>
    %c5_112 = arith.constant 5 : index
    %c0_113 = arith.constant 0 : index
    %155 = memref.load %arg1[%c5_112, %c0_113] : memref<8x8xi32, #tpu.memory_space<smem>>
    %156 = arith.index_cast %155 : i32 to index
    %c0_114 = arith.constant 0 : index
    %157 = vector.load %arg2[%156, %c0_114] : memref<256x128xf32, #tpu.memory_space<vmem>>, vector<1x128xf32>
    %c5_115 = arith.constant 5 : index
    %c1_116 = arith.constant 1 : index
    %158 = memref.load %arg1[%c5_115, %c1_116] : memref<8x8xi32, #tpu.memory_space<smem>>
    %159 = arith.index_cast %158 : i32 to index
    %c0_117 = arith.constant 0 : index
    %160 = vector.load %arg2[%159, %c0_117] : memref<256x128xf32, #tpu.memory_space<vmem>>, vector<1x128xf32>
    %161 = arith.addf %157, %160 : vector<1x128xf32>
    %c5_118 = arith.constant 5 : index
    %c2_119 = arith.constant 2 : index
    %162 = memref.load %arg1[%c5_118, %c2_119] : memref<8x8xi32, #tpu.memory_space<smem>>
    %163 = arith.index_cast %162 : i32 to index
    %c0_120 = arith.constant 0 : index
    %164 = vector.load %arg2[%163, %c0_120] : memref<256x128xf32, #tpu.memory_space<vmem>>, vector<1x128xf32>
    %165 = arith.addf %161, %164 : vector<1x128xf32>
    %c5_121 = arith.constant 5 : index
    %c3_122 = arith.constant 3 : index
    %166 = memref.load %arg1[%c5_121, %c3_122] : memref<8x8xi32, #tpu.memory_space<smem>>
    %167 = arith.index_cast %166 : i32 to index
    %c0_123 = arith.constant 0 : index
    %168 = vector.load %arg2[%167, %c0_123] : memref<256x128xf32, #tpu.memory_space<vmem>>, vector<1x128xf32>
    %169 = arith.addf %165, %168 : vector<1x128xf32>
    %c5_124 = arith.constant 5 : index
    %c4_125 = arith.constant 4 : index
    %170 = memref.load %arg1[%c5_124, %c4_125] : memref<8x8xi32, #tpu.memory_space<smem>>
    %171 = arith.index_cast %170 : i32 to index
    %c0_126 = arith.constant 0 : index
    %172 = vector.load %arg2[%171, %c0_126] : memref<256x128xf32, #tpu.memory_space<vmem>>, vector<1x128xf32>
    %173 = arith.addf %169, %172 : vector<1x128xf32>
    %c5_127 = arith.constant 5 : index
    %c5_128 = arith.constant 5 : index
    %174 = memref.load %arg1[%c5_127, %c5_128] : memref<8x8xi32, #tpu.memory_space<smem>>
    %175 = arith.index_cast %174 : i32 to index
    %c0_129 = arith.constant 0 : index
    %176 = vector.load %arg2[%175, %c0_129] : memref<256x128xf32, #tpu.memory_space<vmem>>, vector<1x128xf32>
    %177 = arith.addf %173, %176 : vector<1x128xf32>
    %c5_130 = arith.constant 5 : index
    %c6_131 = arith.constant 6 : index
    %178 = memref.load %arg1[%c5_130, %c6_131] : memref<8x8xi32, #tpu.memory_space<smem>>
    %179 = arith.index_cast %178 : i32 to index
    %c0_132 = arith.constant 0 : index
    %180 = vector.load %arg2[%179, %c0_132] : memref<256x128xf32, #tpu.memory_space<vmem>>, vector<1x128xf32>
    %181 = arith.addf %177, %180 : vector<1x128xf32>
    %c5_133 = arith.constant 5 : index
    %c7_134 = arith.constant 7 : index
    %182 = memref.load %arg1[%c5_133, %c7_134] : memref<8x8xi32, #tpu.memory_space<smem>>
    %183 = arith.index_cast %182 : i32 to index
    %c0_135 = arith.constant 0 : index
    %184 = vector.load %arg2[%183, %c0_135] : memref<256x128xf32, #tpu.memory_space<vmem>>, vector<1x128xf32>
    %185 = arith.addf %181, %184 : vector<1x128xf32>
    %c6_136 = arith.constant 6 : index
    %c0_137 = arith.constant 0 : index
    %186 = memref.load %arg1[%c6_136, %c0_137] : memref<8x8xi32, #tpu.memory_space<smem>>
    %187 = arith.index_cast %186 : i32 to index
    %c0_138 = arith.constant 0 : index
    %188 = vector.load %arg2[%187, %c0_138] : memref<256x128xf32, #tpu.memory_space<vmem>>, vector<1x128xf32>
    %c6_139 = arith.constant 6 : index
    %c1_140 = arith.constant 1 : index
    %189 = memref.load %arg1[%c6_139, %c1_140] : memref<8x8xi32, #tpu.memory_space<smem>>
    %190 = arith.index_cast %189 : i32 to index
    %c0_141 = arith.constant 0 : index
    %191 = vector.load %arg2[%190, %c0_141] : memref<256x128xf32, #tpu.memory_space<vmem>>, vector<1x128xf32>
    %192 = arith.addf %188, %191 : vector<1x128xf32>
    %c6_142 = arith.constant 6 : index
    %c2_143 = arith.constant 2 : index
    %193 = memref.load %arg1[%c6_142, %c2_143] : memref<8x8xi32, #tpu.memory_space<smem>>
    %194 = arith.index_cast %193 : i32 to index
    %c0_144 = arith.constant 0 : index
    %195 = vector.load %arg2[%194, %c0_144] : memref<256x128xf32, #tpu.memory_space<vmem>>, vector<1x128xf32>
    %196 = arith.addf %192, %195 : vector<1x128xf32>
    %c6_145 = arith.constant 6 : index
    %c3_146 = arith.constant 3 : index
    %197 = memref.load %arg1[%c6_145, %c3_146] : memref<8x8xi32, #tpu.memory_space<smem>>
    %198 = arith.index_cast %197 : i32 to index
    %c0_147 = arith.constant 0 : index
    %199 = vector.load %arg2[%198, %c0_147] : memref<256x128xf32, #tpu.memory_space<vmem>>, vector<1x128xf32>
    %200 = arith.addf %196, %199 : vector<1x128xf32>
    %c6_148 = arith.constant 6 : index
    %c4_149 = arith.constant 4 : index
    %201 = memref.load %arg1[%c6_148, %c4_149] : memref<8x8xi32, #tpu.memory_space<smem>>
    %202 = arith.index_cast %201 : i32 to index
    %c0_150 = arith.constant 0 : index
    %203 = vector.load %arg2[%202, %c0_150] : memref<256x128xf32, #tpu.memory_space<vmem>>, vector<1x128xf32>
    %204 = arith.addf %200, %203 : vector<1x128xf32>
    %c6_151 = arith.constant 6 : index
    %c5_152 = arith.constant 5 : index
    %205 = memref.load %arg1[%c6_151, %c5_152] : memref<8x8xi32, #tpu.memory_space<smem>>
    %206 = arith.index_cast %205 : i32 to index
    %c0_153 = arith.constant 0 : index
    %207 = vector.load %arg2[%206, %c0_153] : memref<256x128xf32, #tpu.memory_space<vmem>>, vector<1x128xf32>
    %208 = arith.addf %204, %207 : vector<1x128xf32>
    %c6_154 = arith.constant 6 : index
    %c6_155 = arith.constant 6 : index
    %209 = memref.load %arg1[%c6_154, %c6_155] : memref<8x8xi32, #tpu.memory_space<smem>>
    %210 = arith.index_cast %209 : i32 to index
    %c0_156 = arith.constant 0 : index
    %211 = vector.load %arg2[%210, %c0_156] : memref<256x128xf32, #tpu.memory_space<vmem>>, vector<1x128xf32>
    %212 = arith.addf %208, %211 : vector<1x128xf32>
    %c6_157 = arith.constant 6 : index
    %c7_158 = arith.constant 7 : index
    %213 = memref.load %arg1[%c6_157, %c7_158] : memref<8x8xi32, #tpu.memory_space<smem>>
    %214 = arith.index_cast %213 : i32 to index
    %c0_159 = arith.constant 0 : index
    %215 = vector.load %arg2[%214, %c0_159] : memref<256x128xf32, #tpu.memory_space<vmem>>, vector<1x128xf32>
    %216 = arith.addf %212, %215 : vector<1x128xf32>
    %c7_160 = arith.constant 7 : index
    %c0_161 = arith.constant 0 : index
    %217 = memref.load %arg1[%c7_160, %c0_161] : memref<8x8xi32, #tpu.memory_space<smem>>
    %218 = arith.index_cast %217 : i32 to index
    %c0_162 = arith.constant 0 : index
    %219 = vector.load %arg2[%218, %c0_162] : memref<256x128xf32, #tpu.memory_space<vmem>>, vector<1x128xf32>
    %c7_163 = arith.constant 7 : index
    %c1_164 = arith.constant 1 : index
    %220 = memref.load %arg1[%c7_163, %c1_164] : memref<8x8xi32, #tpu.memory_space<smem>>
    %221 = arith.index_cast %220 : i32 to index
    %c0_165 = arith.constant 0 : index
    %222 = vector.load %arg2[%221, %c0_165] : memref<256x128xf32, #tpu.memory_space<vmem>>, vector<1x128xf32>
    %223 = arith.addf %219, %222 : vector<1x128xf32>
    %c7_166 = arith.constant 7 : index
    %c2_167 = arith.constant 2 : index
    %224 = memref.load %arg1[%c7_166, %c2_167] : memref<8x8xi32, #tpu.memory_space<smem>>
    %225 = arith.index_cast %224 : i32 to index
    %c0_168 = arith.constant 0 : index
    %226 = vector.load %arg2[%225, %c0_168] : memref<256x128xf32, #tpu.memory_space<vmem>>, vector<1x128xf32>
    %227 = arith.addf %223, %226 : vector<1x128xf32>
    %c7_169 = arith.constant 7 : index
    %c3_170 = arith.constant 3 : index
    %228 = memref.load %arg1[%c7_169, %c3_170] : memref<8x8xi32, #tpu.memory_space<smem>>
    %229 = arith.index_cast %228 : i32 to index
    %c0_171 = arith.constant 0 : index
    %230 = vector.load %arg2[%229, %c0_171] : memref<256x128xf32, #tpu.memory_space<vmem>>, vector<1x128xf32>
    %231 = arith.addf %227, %230 : vector<1x128xf32>
    %c7_172 = arith.constant 7 : index
    %c4_173 = arith.constant 4 : index
    %232 = memref.load %arg1[%c7_172, %c4_173] : memref<8x8xi32, #tpu.memory_space<smem>>
    %233 = arith.index_cast %232 : i32 to index
    %c0_174 = arith.constant 0 : index
    %234 = vector.load %arg2[%233, %c0_174] : memref<256x128xf32, #tpu.memory_space<vmem>>, vector<1x128xf32>
    %235 = arith.addf %231, %234 : vector<1x128xf32>
    %c7_175 = arith.constant 7 : index
    %c5_176 = arith.constant 5 : index
    %236 = memref.load %arg1[%c7_175, %c5_176] : memref<8x8xi32, #tpu.memory_space<smem>>
    %237 = arith.index_cast %236 : i32 to index
    %c0_177 = arith.constant 0 : index
    %238 = vector.load %arg2[%237, %c0_177] : memref<256x128xf32, #tpu.memory_space<vmem>>, vector<1x128xf32>
    %239 = arith.addf %235, %238 : vector<1x128xf32>
    %c7_178 = arith.constant 7 : index
    %c6_179 = arith.constant 6 : index
    %240 = memref.load %arg1[%c7_178, %c6_179] : memref<8x8xi32, #tpu.memory_space<smem>>
    %241 = arith.index_cast %240 : i32 to index
    %c0_180 = arith.constant 0 : index
    %242 = vector.load %arg2[%241, %c0_180] : memref<256x128xf32, #tpu.memory_space<vmem>>, vector<1x128xf32>
    %243 = arith.addf %239, %242 : vector<1x128xf32>
    %c7_181 = arith.constant 7 : index
    %c7_182 = arith.constant 7 : index
    %244 = memref.load %arg1[%c7_181, %c7_182] : memref<8x8xi32, #tpu.memory_space<smem>>
    %245 = arith.index_cast %244 : i32 to index
    %c0_183 = arith.constant 0 : index
    %246 = vector.load %arg2[%245, %c0_183] : memref<256x128xf32, #tpu.memory_space<vmem>>, vector<1x128xf32>
    %247 = arith.addf %243, %246 : vector<1x128xf32>
    %248 = tpu.concatenate %30, %61, %92, %123, %154, %185, %216, %247 in 0 : vector<1x128xf32>, vector<1x128xf32>, vector<1x128xf32>, vector<1x128xf32>, vector<1x128xf32>, vector<1x128xf32>, vector<1x128xf32>, vector<1x128xf32> -> vector<8x128xf32>
    %cst = arith.constant 1.250000e-01 : f32
    %249 = vector.broadcast %cst : f32 to vector<8x128xf32>
    %250 = arith.mulf %248, %249 : vector<8x128xf32>
    %251 = arith.truncf %250 : vector<8x128xf32> to vector<8x128xbf16>
    %c0_184 = arith.constant 0 : index
    %c0_185 = arith.constant 0 : index
    %252 = vector.load %arg3[%c0_184, %c0_185] : memref<8x128xbf16, #tpu.memory_space<vmem>>, vector<8x128xbf16>
    tpu.vector_store %arg3[%c0_184, %c0_185], %251 {strides = array<i32>} : memref<8x128xbf16, #tpu.memory_space<vmem>>, vector<8x128xbf16>,
    return
  }
  func.func @transform_0(%arg0: i32, %arg1: memref<8x8xi32, #tpu.memory_space<smem>>) -> (i32, i32) {
    %c0_i32 = arith.constant 0 : i32
    %c0_i32_0 = arith.constant 0 : i32
    %c0_i32_1 = arith.constant 0 : i32
    return %c0_i32, %c0_i32_0 : i32, i32
  }
  func.func @transform_1(%arg0: i32, %arg1: memref<8x8xi32, #tpu.memory_space<smem>>) -> (i32, i32) {
    %c0_i32 = arith.constant 0 : i32
    %c0_i32_0 = arith.constant 0 : i32
    %c0_i32_1 = arith.constant 0 : i32
    return %c0_i32, %c0_i32_0 : i32, i32
  }
}

</mosaic_0001>

<bundles_post_ra>
// kernel: cbow_forward.3
= control target key start
LH: loop header
LB: loop body
LE: loop exit
PB: predicated region body
PF: predicated region fallthrough
CT: control target
= control target key end

     0   :  { %8 = vsyncpa [#allocation3], 0  ;;  %s351_s0 = inlined_call_operand.vmem [shape: bf16[8,128], index: 0, kind: input, shape index: {}]   ;;  %s352_s1 = inlined_call_operand.hbm [shape: bf16[128,256], index: 1, kind: input, shape index: {}]   ;;  %s353_s2 = inlined_call_operand.vmem [shape: f32[1,256], index: 2, kind: input, shape index: {}]   ;;  %s354_s3 = inlined_call_operand.hbm [shape: f32[8,256], index: 3, kind: output, shape index: {}]  }
   0x1   :  { %9 = vsyncpa [#allocation4], 0  ;;  %s16_s14 = sshll.u32 %s352_s1, 4  ;;  %s315_s15 = smov [#allocation2]   ;;  %s17_s14 = int_to_ptr.hbm [resolvable:$true] %s16_s14 }
   0x2   :  { %s18_s16 = sshll.u32 %s315_s15, 4  ;;  %s316_s17 = smov 128   ;;  %s19_s16 = int_to_ptr.vmem [resolvable:$true] %s18_s16 }
   0x3   :  { %s317_s18 = smov 8  }
   0x4   :  { %24 = dma.hbm_to_vmem [thread:$0]  %s17_s14, 2048, %s19_s16, [#allocation3], %s316_s17, %s316_s17, %s317_s18  }
   0x5   :  { %311 = dma.done.wait [#allocation3], 2048  }
   0x6   :  { %312 = vsyncadd [#allocation3], 4294965248  ;;  %v237_v0 = vld [vmem:[#allocation2 + $0x70] sm:$0xf]  ;;  %v258_v1 = vld [vmem:[#allocation2 + $0x74] sm:$0xf0] }
   0x7   :  { %v257_v2 = vld [vmem:[#allocation2 + $0x74] sm:$0xf]  ;;  %v238_v3 = vor.u32 %v258_v1, %v237_v0  ;;  %v239_v4 = vld [vmem:[#allocation2 + $0x78] sm:$0xf0]  ;;  %v229_v5 = vld [vmem:[#allocation2 + $0x60] sm:$0xf] }
   0x8   :  { %v256_v6 = vld [vmem:[#allocation2 + $0x64] sm:$0xf0]  ;;  %v242_v7 = vor.u32 %v257_v2, %v239_v4  ;;  %v255_v8 = vld [vmem:[#allocation2 + $0x64] sm:$0xf]  ;;  %v231_v9 = vld [vmem:[#allocation2 + $0x68] sm:$0xf0] }
   0x9   :  { %134 = vmatpush.bf16.msra.mxu0 %v238_v3  ;;  %v230_v10 = vor.u32 %v256_v6, %v229_v5  ;;  %v234_v11 = vor.u32 %v255_v8, %v231_v9  ;;  %v221_v12 = vld [vmem:[#allocation2 + $0x50] sm:$0xf]  ;;  %v254_v13 = vld [vmem:[#allocation2 + $0x54] sm:$0xf0]  ;;  %v253_v14 = vld [vmem:[#allocation2 + $0x54] sm:$0xf] }
   0xa   :  { %147 = vmatpush.bf16.msra.mxu1 %v242_v7  ;;  %v223_v15 = vld [vmem:[#allocation2 + $0x58] sm:$0xf0]  ;;  %v222_v16 = vor.u32 %v254_v13, %v221_v12  ;;  %v213_v18 = vld [vmem:[#allocation2 + $0x40] sm:$0xf]  ;;  %v252_v19 = vld [vmem:[#allocation2 + $0x44] sm:$0xf0] }
   0xb   :  { %v226_v17 = vor.u32 %v253_v14, %v223_v15  ;;  %v251_v20 = vld [vmem:[#allocation2 + $0x44] sm:$0xf]  ;;  %v215_v21 = vld [vmem:[#allocation2 + $0x48] sm:$0xf0]  ;;  %v214_v22 = vor.u32 %v252_v19, %v213_v18  ;;  %v205_v24 = vld [vmem:[#allocation2 + $0x30] sm:$0xf] }
   0xc   :  { %v218_v23 = vor.u32 %v251_v20, %v215_v21  ;;  %v250_v25 = vld [vmem:[#allocation2 + $0x34] sm:$0xf0]  ;;  %v249_v26 = vld [vmem:[#allocation2 + $0x34] sm:$0xf]  ;;  %v207_v27 = vld [vmem:[#allocation2 + $0x38] sm:$0xf0] }
   0xd   :  { %135 = vmatpush.bf16.msra.mxu0 %v230_v10  ;;  %v206_v28 = vor.u32 %v250_v25, %v205_v24  ;;  %v210_v29 = vor.u32 %v249_v26, %v207_v27  ;;  %v197_v30 = vld [vmem:[#allocation2 + $0x20] sm:$0xf]  ;;  %v248_v31 = vld [vmem:[#allocation2 + $0x24] sm:$0xf0]  ;;  %v247_v32 = vld [vmem:[#allocation2 + $0x24] sm:$0xf] }
   0xe   :  { %148 = vmatpush.bf16.msra.mxu1 %v234_v11  ;;  %v199_v33 = vld [vmem:[#allocation2 + $0x28] sm:$0xf0]  ;;  %v198_v34 = vor.u32 %v248_v31, %v197_v30  ;;  %v189_v36 = vld [vmem:[#allocation2 + $0x10] sm:$0xf]  ;;  %v246_v37 = vld [vmem:[#allocation2 + $0x14] sm:$0xf0] }
   0xf   :  { %v202_v35 = vor.u32 %v247_v32, %v199_v33  ;;  %v245_v38 = vld [vmem:[#allocation2 + $0x14] sm:$0xf]  ;;  %v191_v39 = vld [vmem:[#allocation2 + $0x18] sm:$0xf0]  ;;  %v190_v40 = vor.u32 %v246_v37, %v189_v36  ;;  %v181_v42 = vld [vmem:[#allocation2] sm:$0xf] }
  0x10   :  { %v194_v41 = vor.u32 %v245_v38, %v191_v39  ;;  %v244_v43 = vld [vmem:[#allocation2 + $0x4] sm:$0xf0]  ;;  %v243_v44 = vld [vmem:[#allocation2 + $0x4] sm:$0xf]  ;;  %v183_v45 = vld [vmem:[#allocation2 + $0x8] sm:$0xf0] }
  0x11   :  { %136 = vmatpush.bf16.msra.mxu0 %v222_v16  ;;  %v182_v46 = vor.u32 %v244_v43, %v181_v42  ;;  %v186_v47 = vor.u32 %v243_v44, %v183_v45  ;;  %v31_v48 = vld [vmem:[%s351_s0] sm:$0xf]  ;;  %s318_s22 = smov [#allocation5]   ;;  %s169_s26 = sshll.u32 %s354_s3, 4  ;;  %s170_s26 = int_to_ptr.hbm [resolvable:$true] %s169_s26 }
  0x12   :  { %149 = vmatpush.bf16.msra.mxu1 %v226_v17  ;;  %v48_v49 = vld [vmem:[%s353_s2] sm:$0x3]  ;;  %s167_s23 = sshll.u32 %s318_s22, 4  ;;  %s168_s23 = int_to_ptr.vmem [resolvable:$true] %s167_s23 }
  0x13   :  { %v50_v50 = vperm.slane %v48_v49, 0  ;;  %v51_v51 = vperm.slane %v48_v49, 1 }
  0x15   :  { %137 = vmatpush.bf16.msra.mxu0 %v214_v22 }
  0x16   :  { %150 = vmatpush.bf16.msra.mxu1 %v218_v23 }
  0x19   :  { %138 = vmatpush.bf16.msra.mxu0 %v206_v28 }
  0x1a   :  { %151 = vmatpush.bf16.msra.mxu1 %v210_v29 }
  0x1d   :  { %139 = vmatpush.bf16.msra.mxu0 %v198_v34 }
  0x1e   :  { %152 = vmatpush.bf16.msra.mxu1 %v202_v35 }
  0x21   :  { %140 = vmatpush.bf16.msra.mxu0 %v190_v40 }
  0x22   :  { %153 = vmatpush.bf16.msra.mxu1 %v194_v41 }
  0x25   :  { %141 = vmatpush.bf16.msra.mxu0 %v182_v46 }
  0x26   :  { %154 = vmatpush.bf16.msra.mxu1 %v186_v47 }
  0x28   :  { %142 = vmatmul.bf16.vlgmr.msra.gmra.mxu0 %v31_v48 }
  0x29   :  { %155 = vmatmul.bf16.vlgmr.msra.gmra.mxu1 %v31_v48 }
  0xa5   :  { %v143_v52 = vpop.f32.mrf.mxu0 }
  0xa6   :  { %v144_v53 = vadd.f32 %v143_v52, %v50_v50  ;;  %v156_v54 = vpop.f32.mrf.mxu1 }
  0xa7   :  { %v157_v55 = vadd.f32 %v156_v54, %v51_v51 }
  0xa8   :  { %160 = vst [vmem:[#allocation5] sm:$0xff] %v144_v53 }
  0xa9   :  { %161 = vst [vmem:[#allocation5 + $0x8] sm:$0xff] %v157_v55 }
  0xaa   :  { %172 = dma.vmem_to_hbm [thread:$0]  %s168_s23, 256, %s170_s26, [#allocation4]  }
  0xad   :  { %v145_v56 = vpop.f32.mrf.mxu0 }
  0xae   :  { %v158_v57 = vpop.f32.mrf.mxu1 }
  0xaf   :  { %313 = dma.done.wait [#allocation4], 256  }
  0xb0   :  { %314 = vsyncadd [#allocation4], 4294967040 }
  0xb1   :  { %177 = vsyncpa [#allocation3], 1 }
  0xb2   :  { %178 = vsyncpa [#allocation4], 1 }

// kernel: cbow_forward.2
= control target key start
LH: loop header
LB: loop body
LE: loop exit
PB: predicated region body
PF: predicated region fallthrough
CT: control target
= control target key end

     0   :  { %s495_s12 = smov [#allocation3]   ;;  %s701_s0 = inlined_call_operand.hbm [shape: s32[8,8], index: 0, kind: input, shape index: {}]   ;;  %s702_s1 = inlined_call_operand.hbm [shape: f32[256,128], index: 1, kind: input, shape index: {}]   ;;  %s703_s2 = inlined_call_operand.vmem [shape: bf16[8,128], index: 2, kind: output, shape index: {}]  }
   0x1   :  { %704 = sst [smem:[#allocation13_spill]] %s703_s2  ;;  %s8_s11 = sshll.u32 %s701_s0, 4  ;;  %s9_s11 = int_to_ptr.hbm [resolvable:$true] %s8_s11 }
   0x2   :  { %11 = dma.hbm_to_smem %s9_s11, 128, %s495_s12, [#allocation2] }
   0x3   :  { %491 = dma.done.wait [#allocation2], 128 }
   0x4   :  { %492 = vsyncadd [#allocation2], 4294967168 }
   0x5   :  { %14 = sfence }
   0x6   :  { %15 = vsyncpa [#allocation5], 0  ;;  %s20_s15 = sshll.u32 %s702_s1, 4  ;;  %s496_s16 = smov [#allocation4]   ;;  %s21_s15 = int_to_ptr.hbm [resolvable:$true] %s20_s15 }
   0x7   :  { %s22_s17 = sshll.u32 %s496_s16, 4  ;;  %s497_s18 = smov 128   ;;  %s23_s17 = int_to_ptr.vmem [resolvable:$true] %s22_s17 }
   0x8   :  { %s498_s19 = smov 8  }
   0x9   :  { %28 = dma.hbm_to_vmem [thread:$0]  %s21_s15, 4096, %s23_s17, [#allocation5], %s497_s18, %s497_s18, %s498_s19  }
   0xa   :  { %493 = dma.done.wait [#allocation5], 4096  }
   0xb   :  { %494 = vsyncadd [#allocation5], 4294963200  ;;  %s520_s0 = sld [smem:[#allocation3]]  ;;  %vm302_vm0 = vcmask 1040384   ;;  %vm304_vm1 = vcmask 1041408   ;;  %vm306_vm2 = vcmask 1042432  }
   0xc   :  { %s522_s20 = sld [smem:[#allocation3 + $0x1]]  ;;  %vm308_vm3 = vcmask 1043456   ;;  %vm310_vm4 = vcmask 1044480   ;;  %vm312_vm5 = vcmask 1045504   ;;  %vm314_vm6 = vcmask 1046528  }
   0xd   :  { %s524_s21 = sld [smem:[#allocation3 + $0x2]] }
   0xe   :  { %s526_s22 = sld [smem:[#allocation3 + $0x3]] }
   0xf   :  { %s528_s23 = sld [smem:[#allocation3 + $0x4]] }
  0x10   :  { %s530_s1 = sld [smem:[#allocation3 + $0x5]] }
  0x11   :  { %s532_s24 = sld [smem:[#allocation3 + $0x6]] }
  0x12   :  { %s534_s25 = sld [smem:[#allocation3 + $0x7]] }
  0x13   :  { %s395_s26 = sld [smem:[#allocation3 + $0x80]] }
  0x14   :  { %s396_s27 = sld [smem:[#allocation3 + $0x81]] }
  0x15   :  { %s536_s28 = sld [smem:[#allocation3 + $0x82]] }
  0x16   :  { %s538_s29 = sld [smem:[#allocation3 + $0x83]] }
  0x17   :  { %705 = sst [smem:[#allocation8_spill]] %s532_s24 }
  0x18   :  { %706 = sst [smem:[#allocation9_spill]] %s534_s25  ;;  %s34_s25 = scalar_lea.vmem [#allocation4], %s520_s0 }
  0x19   :  { %s540_s30 = sld [smem:[#allocation3 + $0x84]]  ;;  %s65_s17 = scalar_lea.vmem [#allocation4], %s395_s26  ;;  %v35_v2 = vld [vmem:[%s34_s25] sm:$0x1] }
  0x1a   :  { %s542_s3 = sld [smem:[#allocation3 + $0x85]]  ;;  %v66_v0 = vld [vmem:[%s65_s17] sm:$0x1]  ;;  %s68_s19 = scalar_lea.vmem [#allocation4], %s396_s27 }
  0x1b   :  { %s544_s4 = sld [smem:[#allocation3 + $0x86]]  ;;  %v69_v1 = vld [vmem:[%s68_s19] sm:$0x1]  ;;  %s72_s17 = scalar_lea.vmem [#allocation4], %s536_s28 }
  0x1c   :  { %s546_s5 = sld [smem:[#allocation3 + $0x87]]  ;;  %v70_v5 = vadd.f32 %v69_v1, %v66_v0  ;;  %v73_v7 = vld [vmem:[%s72_s17] sm:$0x1]  ;;  %s45_s19 = scalar_lea.vmem [#allocation4], %s526_s22 }
  0x1d   :  { %s403_s6 = sld [smem:[#allocation3 + $0x100]]  ;;  %v46_v16 = vld [vmem:[%s45_s19] sm:$0x1]  ;;  %s53_s19 = scalar_lea.vmem [#allocation4], %s530_s1 }
  0x1e   :  { %s404_s7 = sld [smem:[#allocation3 + $0x101]]  ;;  %v74_v13 = vadd.f32 %v73_v7, %v70_v5  ;;  %v54_v37 = vld [vmem:[%s53_s19] sm:$0x1] }
  0x1f   :  { %s548_s8 = sld [smem:[#allocation3 + $0x102]] }
  0x20   :  { %s550_s9 = sld [smem:[#allocation3 + $0x103]] }
  0x21   :  { %s552_s10 = sld [smem:[#allocation3 + $0x104]] }
  0x22   :  { %707 = sst [smem:[#allocation10_spill]] %s546_s5 }
  0x23   :  { %s554_s11 = sld [smem:[#allocation3 + $0x105]]  ;;  %s96_s5 = scalar_lea.vmem [#allocation4], %s403_s6 }
  0x24   :  { %s556_s12 = sld [smem:[#allocation3 + $0x106]]  ;;  %v97_v4 = vld [vmem:[%s96_s5] sm:$0x1]  ;;  %s99_s26 = scalar_lea.vmem [#allocation4], %s404_s7 }
  0x25   :  { %s558_s13 = sld [smem:[#allocation3 + $0x107]]  ;;  %v100_v6 = vld [vmem:[%s99_s26] sm:$0x1]  ;;  %s103_s28 = scalar_lea.vmem [#allocation4], %s548_s8 }
  0x26   :  { %s411_s14 = sld [smem:[#allocation3 + $0x180]]  ;;  %v101_v11 = vadd.f32 %v100_v6, %v97_v4  ;;  %v104_v14 = vld [vmem:[%s103_s28] sm:$0x1]  ;;  %s107_s26 = scalar_lea.vmem [#allocation4], %s550_s9 }
  0x27   :  { %s560_s15 = sld [smem:[#allocation3 + $0x181]]  ;;  %v108_v17 = vld [vmem:[%s107_s26] sm:$0x1]  ;;  %s80_s8 = scalar_lea.vmem [#allocation4], %s540_s30 }
  0x28   :  { %s562_s16 = sld [smem:[#allocation3 + $0x182]]  ;;  %v81_v20 = vld [vmem:[%s80_s8] sm:$0x1]  ;;  %v105_v21 = vadd.f32 %v104_v14, %v101_v11  ;;  %s111_s28 = scalar_lea.vmem [#allocation4], %s552_s10 }
  0x29   :  { %s564_s18 = sld [smem:[#allocation3 + $0x183]]  ;;  %v112_v34 = vld [vmem:[%s111_s28] sm:$0x1] }
  0x2a   :  { %708 = sst [smem:[#allocation11_spill]] %s556_s12  ;;  %s37_s12 = scalar_lea.vmem [#allocation4], %s522_s20  ;;  %v109_v31 = vadd.f32 %v108_v17, %v105_v21 }
  0x2b   :  { %709 = sst [smem:[#allocation12_spill]] %s558_s13  ;;  %v38_v3 = vld [vmem:[%s37_s12] sm:$0x1]  ;;  %s41_s20 = scalar_lea.vmem [#allocation4], %s524_s21 }
  0x2c   :  { %s566_s2 = sld [smem:[#allocation3 + $0x184]]  ;;  %v42_v8 = vld [vmem:[%s41_s20] sm:$0x1]  ;;  %s127_s25 = scalar_lea.vmem [#allocation4], %s411_s14  ;;  %v39_v10 = vadd.f32 %v38_v3, %v35_v2  ;;  %v113_v43 = vadd.f32 %v112_v34, %v109_v31 }
  0x2d   :  { %s570_s13 = sld [smem:[#allocation3 + $0x185]]  ;;  %v128_v9 = vld [vmem:[%s127_s25] sm:$0x1]  ;;  %s130_s6 = scalar_lea.vmem [#allocation4], %s560_s15 }
  0x2e   :  { %s572_s24 = sld [smem:[#allocation3 + $0x186]]  ;;  %v131_v12 = vld [vmem:[%s130_s6] sm:$0x1]  ;;  %s76_s21 = scalar_lea.vmem [#allocation4], %s538_s29  ;;  %v43_v19 = vadd.f32 %v42_v8, %v39_v10 }
  0x2f   :  { %s574_s27 = sld [smem:[#allocation3 + $0x187]]  ;;  %v77_v15 = vld [vmem:[%s76_s21] sm:$0x1]  ;;  %v132_v18 = vadd.f32 %v131_v12, %v128_v9  ;;  %s134_s17 = scalar_lea.vmem [#allocation4], %s562_s16 }
  0x30   :  { %s577_s0 = sld [smem:[#allocation3 + $0x200]]  ;;  %v135_v22 = vld [vmem:[%s134_s17] sm:$0x1]  ;;  %v78_v23 = vadd.f32 %v77_v15, %v74_v13  ;;  %s49_s6 = scalar_lea.vmem [#allocation4], %s528_s23  ;;  %v47_v30 = vadd.f32 %v46_v16, %v43_v19 }
  0x31   :  { %s580_s5 = sld [smem:[#allocation3 + $0x201]]  ;;  %v50_v26 = vld [vmem:[%s49_s6] sm:$0x1]  ;;  %v136_v27 = vadd.f32 %v135_v22, %v132_v18  ;;  %s84_s21 = scalar_lea.vmem [#allocation4], %s542_s3 }
  0x32   :  { %s583_s7 = sld [smem:[#allocation3 + $0x202]]  ;;  %v82_v33 = vadd.f32 %v81_v20, %v78_v23  ;;  %v85_v35 = vld [vmem:[%s84_s21] sm:$0x1]  ;;  %v51_v41 = vadd.f32 %v50_v26, %v47_v30  ;;  %s88_s3 = scalar_lea.vmem [#allocation4], %s544_s4 }
  0x33   :  { %s586_s12 = sld [smem:[#allocation3 + $0x203]]  ;;  %v89_v42 = vld [vmem:[%s88_s3] sm:$0x1]  ;;  %s142_s17 = scalar_lea.vmem [#allocation4], %s566_s2 }
  0x34   :  { %s589_s14 = sld [smem:[#allocation3 + $0x204]]  ;;  %v143_v44 = vld [vmem:[%s142_s17] sm:$0x1]  ;;  %v86_v45 = vadd.f32 %v85_v35, %v82_v33  ;;  %s146_s6 = scalar_lea.vmem [#allocation4], %s570_s13  ;;  %v55_v55 = vadd.f32 %v54_v37, %v51_v41 }
  0x35   :  { %s593_s15 = sld [smem:[#allocation3 + $0x205]]  ;;  %v147_v48 = vld [vmem:[%s146_s6] sm:$0x1] }
  0x36   :  { %s597_s29 = sld [smem:[#allocation3 + $0x206]]  ;;  %s158_s22 = scalar_lea.vmem [#allocation4], %s577_s0  ;;  %v90_v59 = vadd.f32 %v89_v42, %v86_v45 }
  0x37   :  { %v159_v24 = vld [vmem:[%s158_s22] sm:$0x1]  ;;  %s600_s20 = sld [smem:[#allocation3 + $0x207]]  ;;  %s161_s9 = scalar_lea.vmem [#allocation4], %s580_s5 }
  0x38   :  { %v162_v25 = vld [vmem:[%s161_s9] sm:$0x1]  ;;  %s603_s25 = sld [smem:[#allocation3 + $0x280]]  ;;  %s165_s30 = scalar_lea.vmem [#allocation4], %s583_s7 }
  0x39   :  { %v163_v28 = vadd.f32 %v162_v25, %v159_v24  ;;  %v166_v29 = vld [vmem:[%s165_s30] sm:$0x1]  ;;  %s607_s16 = sld [smem:[#allocation3 + $0x281]]  ;;  %s138_s0 = scalar_lea.vmem [#allocation4], %s564_s18 }
  0x3a   :  { %v139_v32 = vld [vmem:[%s138_s0] sm:$0x1]  ;;  %s610_s5 = sld [smem:[#allocation3 + $0x282]]  ;;  %s115_s18 = scalar_lea.vmem [#allocation4], %s554_s11 }
  0x3b   :  { %s613_s23 = sld [smem:[#allocation3 + $0x283]]  ;;  %v167_v36 = vadd.f32 %v166_v29, %v163_v28  ;;  %v116_v38 = vld [vmem:[%s115_s18] sm:$0x1]  ;;  %v140_v39 = vadd.f32 %v139_v32, %v136_v27  ;;  %s169_s26 = scalar_lea.vmem [#allocation4], %s586_s12 }
  0x3c   :  { %s616_s7 = sld [smem:[#allocation3 + $0x284]]  ;;  %v170_v40 = vld [vmem:[%s169_s26] sm:$0x1]  ;;  %s173_s11 = scalar_lea.vmem [#allocation4], %s589_s14  ;;  %v117_v57 = vadd.f32 %v116_v38, %v113_v43 }
  0x3d   :  { %s621_s10 = sld [smem:[#allocation3 + $0x285]]  ;;  %v174_v46 = vld [vmem:[%s173_s11] sm:$0x1]  ;;  %v171_v49 = vadd.f32 %v170_v40, %v167_v36  ;;  %v144_v52 = vadd.f32 %v143_v44, %v140_v39  ;;  %s150_s26 = scalar_lea.vmem [#allocation4], %s572_s24 }
  0x3e   :  { %s710_s8 = sld [smem:[#allocation8_spill]]  ;;  %s189_s22 = scalar_lea.vmem [#allocation4], %s603_s25  ;;  %v151_v62 = vld [vmem:[%s150_s26] sm:$0x1] }
  0x3f   :  { %s625_s1 = sld [smem:[#allocation3 + $0x286]]  ;;  %v190_v47 = vld [vmem:[%s189_s22] sm:$0x1]  ;;  %s192_s4 = scalar_lea.vmem [#allocation4], %s607_s16  ;;  %v175_v63 = vadd.f32 %v174_v46, %v171_v49  ;;  %v148_v3 = vadd.f32 %v147_v48, %v144_v52 }
  0x40   :  { %s711_s12 = sld [smem:[#allocation10_spill]]  ;;  %v193_v50 = vld [vmem:[%s192_s4] sm:$0x1]  ;;  %s196_s14 = scalar_lea.vmem [#allocation4], %s610_s5 }
  0x41   :  { %s629_s9 = sld [smem:[#allocation3 + $0x287]]  ;;  %v194_v53 = vadd.f32 %v193_v50, %v190_v47  ;;  %v197_v54 = vld [vmem:[%s196_s14] sm:$0x1]  ;;  %s200_s16 = scalar_lea.vmem [#allocation4], %s613_s23  ;;  %v152_v16 = vadd.f32 %v151_v62, %v148_v3 }
  0x42   :  { %s633_s30 = sld [smem:[#allocation3 + $0x300]]  ;;  %v201_v58 = vld [vmem:[%s200_s16] sm:$0x1]  ;;  %s204_s3 = scalar_lea.vmem [#allocation4], %s616_s7 }
  0x43   :  { %s712_s2 = sld [smem:[#allocation11_spill]]  ;;  %v198_v61 = vadd.f32 %v197_v54, %v194_v53  ;;  %v205_v0 = vld [vmem:[%s204_s3] sm:$0x1]  ;;  %s177_s11 = scalar_lea.vmem [#allocation4], %s593_s15 }
  0x44   :  { %s57_s0 = scalar_lea.vmem [#allocation4], %s710_s8  ;;  %s637_s25 = sld [smem:[#allocation3 + $0x301]]  ;;  %v178_v4 = vld [vmem:[%s177_s11] sm:$0x1] }
  0x45   :  { %v58_v51 = vld [vmem:[%s57_s0] sm:$0x1]  ;;  %s713_s28 = sld [smem:[#allocation9_spill]]  ;;  %v202_v5 = vadd.f32 %v201_v58, %v198_v61  ;;  %s208_s24 = scalar_lea.vmem [#allocation4], %s621_s10  ;;  %v179_v14 = vadd.f32 %v178_v4, %v175_v63 }
  0x46   :  { %s92_s13 = scalar_lea.vmem [#allocation4], %s711_s12  ;;  %s714_s21 = sld [smem:[#allocation12_spill]]  ;;  %v59_v6 = vadd.f32 %v58_v51, %v55_v55  ;;  %v209_v8 = vld [vmem:[%s208_s24] sm:$0x1] }
  0x47   :  { %v93_v56 = vld [vmem:[%s92_s13] sm:$0x1]  ;;  %s641_s19 = sld [smem:[#allocation3 + $0x302]]  ;;  %s181_s12 = scalar_lea.vmem [#allocation4], %s597_s29  ;;  %v206_v11 = vadd.f32 %v205_v0, %v202_v5 }
  0x48   :  { %s644_s5 = sld [smem:[#allocation3 + $0x303]]  ;;  %v94_v9 = vadd.f32 %v93_v56, %v90_v59  ;;  %v182_v10 = vld [vmem:[%s181_s12] sm:$0x1]  ;;  %s220_s6 = scalar_lea.vmem [#allocation4], %s633_s30 }
  0x49   :  { %s119_s18 = scalar_lea.vmem [#allocation4], %s712_s2  ;;  %s648_s8 = sld [smem:[#allocation3 + $0x304]]  ;;  %v221_v12 = vld [vmem:[%s220_s6] sm:$0x1]  ;;  %v210_v22 = vadd.f32 %v209_v8, %v206_v11  ;;  %v183_v25 = vadd.f32 %v182_v10, %v179_v14 }
  0x4a   :  { %v120_v60 = vld [vmem:[%s119_s18] sm:$0x1]  ;;  %s653_s22 = sld [smem:[#allocation3 + $0x305]]  ;;  %s154_s4 = scalar_lea.vmem [#allocation4], %s574_s27  ;;  %v282_v24 = vrot.slane %v94_v9, 7 }
  0x4b   :  { %s61_s23 = scalar_lea.vmem [#allocation4], %s713_s28  ;;  %v121_v7 = vadd.f32 %v120_v60, %v117_v57  ;;  %s656_s7 = sld [smem:[#allocation3 + $0x306]]  ;;  %v155_v13 = vld [vmem:[%s154_s4] sm:$0x1] }
  0x4c   :  { %v62_v1 = vld [vmem:[%s61_s23] sm:$0x1]  ;;  %s123_s17 = scalar_lea.vmem [#allocation4], %s714_s21  ;;  %s660_s15 = sld [smem:[#allocation3 + $0x307]]  ;;  %v156_v28 = vadd.f32 %v155_v13, %v152_v16 }
  0x4d   :  { %v124_v2 = vld [vmem:[%s123_s17] sm:$0x1]  ;;  %s223_s2 = scalar_lea.vmem [#allocation4], %s637_s25  ;;  %s664_s0 = sld [smem:[#allocation3 + $0x380]]  ;;  %v63_v19 = vadd.f32 %v62_v1, %v59_v6 }
  0x4e   :  { %v224_v15 = vld [vmem:[%s223_s2] sm:$0x1]  ;;  %s227_s10 = scalar_lea.vmem [#allocation4], %s641_s19  ;;  %s667_s29 = sld [smem:[#allocation3 + $0x381]]  ;;  %v125_v20 = vadd.f32 %v124_v2, %v121_v7  ;;  %v288_v44 = vrot.slane %v156_v28, 5 }
  0x4f   :  { %v225_v17 = vadd.f32 %v224_v15, %v221_v12  ;;  %v228_v18 = vld [vmem:[%s227_s10] sm:$0x1]  ;;  %s231_s30 = scalar_lea.vmem [#allocation4], %s644_s5  ;;  %s670_s27 = sld [smem:[#allocation3 + $0x382]]  ;;  %v303_v37 = vsel %vm302_vm0, %v63_v19, %v282_v24 }
  0x50   :  { %v232_v21 = vld [vmem:[%s231_s30] sm:$0x1]  ;;  %s672_s14 = sld [smem:[#allocation3 + $0x383]]  ;;  %s212_s25 = scalar_lea.vmem [#allocation4], %s625_s1  ;;  %v285_v33 = vrot.slane %v125_v20, 6 }
  0x51   :  { %v229_v23 = vadd.f32 %v228_v18, %v225_v17  ;;  %v213_v26 = vld [vmem:[%s212_s25] sm:$0x1]  ;;  %s235_s13 = scalar_lea.vmem [#allocation4], %s648_s8  ;;  %s676_s28 = sld [smem:[#allocation3 + $0x384]] }
  0x52   :  { %v236_v27 = vld [vmem:[%s235_s13] sm:$0x1]  ;;  %s185_s16 = scalar_lea.vmem [#allocation4], %s600_s20  ;;  %s679_s21 = sld [smem:[#allocation3 + $0x385]]  ;;  %v214_v34 = vadd.f32 %v213_v26, %v210_v22  ;;  %v305_v46 = vsel %vm304_vm1, %v303_v37, %v285_v33 }
  0x53   :  { %v186_v29 = vld [vmem:[%s185_s16] sm:$0x1]  ;;  %v233_v30 = vadd.f32 %v232_v21, %v229_v23  ;;  %s216_s19 = scalar_lea.vmem [#allocation4], %s629_s9  ;;  %s239_s18 = scalar_lea.vmem [#allocation4], %s653_s22  ;;  %v307_v54 = vsel %vm306_vm2, %v305_v46, %v288_v44 }
  0x54   :  { %v217_v31 = vld [vmem:[%s216_s19] sm:$0x1]  ;;  %s683_s5 = sld [smem:[#allocation3 + $0x386]]  ;;  %s251_s1 = scalar_lea.vmem [#allocation4], %s664_s0  ;;  %v187_v38 = vadd.f32 %v186_v29, %v183_v25 }
  0x55   :  { %v240_v32 = vld [vmem:[%s239_s18] sm:$0x1]  ;;  %v237_v35 = vadd.f32 %v236_v27, %v233_v30  ;;  %s686_s20 = sld [smem:[#allocation3 + $0x387]]  ;;  %s243_s9 = scalar_lea.vmem [#allocation4], %s656_s7  ;;  %v218_v47 = vadd.f32 %v217_v31, %v214_v34 }
  0x56   :  { %v252_v36 = vld [vmem:[%s251_s1] sm:$0x1]  ;;  %s254_s26 = scalar_lea.vmem [#allocation4], %s667_s29  ;;  %s258_s3 = scalar_lea.vmem [#allocation4], %s670_s27  ;;  %v291_v52 = vrot.slane %v187_v38, 4 }
  0x57   :  { %v244_v39 = vld [vmem:[%s243_s9] sm:$0x1]  ;;  %v241_v41 = vadd.f32 %v240_v32, %v237_v35  ;;  %s262_s8 = scalar_lea.vmem [#allocation4], %s672_s14  ;;  %s247_s23 = scalar_lea.vmem [#allocation4], %s660_s15  ;;  %v294_v58 = vrot.slane %v218_v47, 3 }
  0x58   :  { %v255_v40 = vld [vmem:[%s254_s26] sm:$0x1]  ;;  %s266_s17 = scalar_lea.vmem [#allocation4], %s676_s28  ;;  %s270_s11 = scalar_lea.vmem [#allocation4], %s679_s21  ;;  %v309_v60 = vsel %vm308_vm3, %v307_v54, %v291_v52 }
  0x59   :  { %v256_v42 = vadd.f32 %v255_v40, %v252_v36  ;;  %v259_v43 = vld [vmem:[%s258_s3] sm:$0x1]  ;;  %v245_v48 = vadd.f32 %v244_v39, %v241_v41  ;;  %v311_v1 = vsel %vm310_vm4, %v309_v60, %v294_v58  ;;  %s715_s6 = sld [smem:[#allocation13_spill]] }
  0x5a   :  { %v263_v45 = vld [vmem:[%s262_s8] sm:$0x1]  ;;  %s274_s22 = scalar_lea.vmem [#allocation4], %s683_s5 }
  0x5b   :  { %v248_v49 = vld [vmem:[%s247_s23] sm:$0x1]  ;;  %v260_v50 = vadd.f32 %v259_v43, %v256_v42  ;;  %s278_s24 = scalar_lea.vmem [#allocation4], %s686_s20 }
  0x5c   :  { %v267_v51 = vld [vmem:[%s266_s17] sm:$0x1]  ;;  %v249_v55 = vadd.f32 %v248_v49, %v245_v48 }
  0x5d   :  { %v264_v53 = vadd.f32 %v263_v45, %v260_v50  ;;  %v271_v56 = vld [vmem:[%s270_s11] sm:$0x1] }
  0x5e   :  { %v275_v59 = vld [vmem:[%s274_s22] sm:$0x1]  ;;  %v297_v63 = vrot.slane %v249_v55, 2 }
  0x5f   :  { %v268_v57 = vadd.f32 %v267_v51, %v264_v53  ;;  %v279_v62 = vld [vmem:[%s278_s24] sm:$0x1] }
  0x60   :  { %v313_v3 = vsel %vm312_vm5, %v311_v1, %v297_v63 }
  0x61   :  { %v272_v61 = vadd.f32 %v271_v56, %v268_v57 }
  0x63   :  { %v276_v0 = vadd.f32 %v275_v59, %v272_v61 }
  0x65   :  { %v280_v2 = vadd.f32 %v279_v62, %v276_v0 }
  0x67   :  { %v300_v4 = vrot.slane %v280_v2, 1 }
  0x69   :  { %v315_v5 = vsel %vm314_vm6, %v313_v3, %v300_v4 }
  0x6a   :  { %v316_v6 = vmul.f32 0.125, %v315_v5 }
  0x6c   :  { %v317_v7 = vpack.c.bf16 %v316_v6, %v316_v6 }
  0x6e   :  { %318 = vst [vmem:[%s715_s6] sm:$0xf] %v317_v7 }
  0x6f   :  { %323 = vsyncpa [#allocation5], 1 }

</bundles_post_ra>
